<compile_context>
chip_gen: v5e
topology: v5e:2x2
jax: 0.10.0
libtpu: 0.0.40
codegen_flags: <defaults>
</compile_context>

<pallas_src>
import functools
import math

import jax
import jax.numpy as jnp
from jax import lax
from jax.experimental import pallas as pl
from jax.experimental.pallas import tpu as pltpu


def _sepconv_kernel(x_ref, dww_ref, pww_ref, pwb_ref, o_ref, *, H, W):
    # x_ref  : (C_in, L)      flattened (H*W) input, one batch element
    # dww_ref: (9, C_in, 1)   depthwise 3x3 weights, tap-major
    # pww_ref: (C_out, C_in)  pointwise (1x1) weights
    # pwb_ref: (C_out, 1)     pointwise bias (depthwise bias already folded in)
    # o_ref  : (C_out, L)     flattened output, one batch element
    C_in, L = x_ref.shape

    x = x_ref[...].astype(jnp.float32)          # (C_in, L)
    dww = dww_ref[...].astype(jnp.float32)      # (9, C_in, 1)

    # Flattened-position masks for reflect boundary handling (built once; a
    # handful of vreg ops at these tile sizes).
    idx = lax.broadcasted_iota(jnp.int32, (C_in, L), 1)
    col = idx % W
    is_col_first = col == 0
    is_col_last = col == (W - 1)
    is_row_first = idx < W
    is_row_last = idx >= (L - W)

    def _roll(v, s):
        # Static-shift rotation along the flattened lane axis (XLU slot):
        #   result[i] = v[(i - s) mod L]
        return jnp.roll(v, s, axis=-1)

    # Vertically shifted variants (dh = -1, 0, +1) with reflect boundary:
    # a +-W rotation, with the opposite rotation selected on the edge row.
    x_up = jnp.where(is_row_first, _roll(x, -W), _roll(x, W))    # x[h-1] (reflect)
    x_dn = jnp.where(is_row_last, _roll(x, W), _roll(x, -W))     # x[h+1] (reflect)
    rows = (x_up, x, x_dn)

    # Depthwise 3x3: 9 lane-dense multiply-accumulates on the VPU, seeded with
    # the centre tap (kh=1, kw=1) so there is no zero-init pass.
    acc = x * dww[4]
    for kh in range(3):
        v = rows[kh]
        v_l = _roll(v, 1)    # v[.., w-1] away from the edges
        v_r = _roll(v, -1)   # v[.., w+1] away from the edges
        taps = (
            jnp.where(is_col_first, v_r, v_l),   # dw = -1 (reflect at w=0)
            v,                                   # dw =  0
            jnp.where(is_col_last, v_l, v_r),    # dw = +1 (reflect at w=W-1)
        )
        for kw in range(3):
            if kh == 1 and kw == 1:
                continue                          # centre tap already in acc
            acc = acc + taps[kw] * dww[kh * 3 + kw]   # (C_in,1) lane-broadcast

    # Pointwise 1x1 conv == channel-mixing matmul on lane-dense operands (MXU).
    pww = pww_ref[...].astype(jnp.float32)                     # (C_out, C_in)
    y = jnp.dot(pww, acc, preferred_element_type=jnp.float32)  # (C_out, L)
    y = y + pwb_ref[...].astype(jnp.float32)                   # bias broadcast

    # norm='' and activation='' are Identity -> nothing to do.
    o_ref[...] = y.astype(o_ref.dtype)


def my_conv2d(x, dw_weight, dw_bias, pw_weight, pw_bias, *, padding=1):
    """x: (N, C_in, H, W) -> (N, C_out, H, W).

    3x3 depthwise conv (groups=C_in, reflect padding=1, stride=1, bias)
    followed by a 1x1 pointwise conv (bias). norm/activation are Identity.
    """
    N, C_in, H, W = x.shape
    C_out = pw_weight.shape[0]
    KH, KW = dw_weight.shape[2], dw_weight.shape[3]
    assert (KH, KW) == (3, 3) and padding == 1, (
        "kernel implements 3x3 depthwise conv with reflect padding=1, stride=1")
    assert H >= 2 and W >= 2, "reflect padding=1 requires H, W >= 2"
    L = H * W

    # Lane-dense views / parameter prep (free or tiny in XLA).
    xf = x.reshape(N, C_in, L)
    dww = jnp.transpose(dw_weight.reshape(C_in, KH * KW), (1, 0)).reshape(
        KH * KW, C_in, 1)                          # tap-major (9, C_in, 1)
    pww = pw_weight.reshape(C_out, C_in)
    # Fold the depthwise bias through the (linear) pointwise conv.
    pwb = (pw_bias + pww @ dw_bias).reshape(C_out, 1)

    kernel = functools.partial(_sepconv_kernel, H=H, W=W)

    grid_spec = pltpu.PrefetchScalarGridSpec(
        num_scalar_prefetch=0,
        grid=(N,),
        in_specs=[
            pl.BlockSpec((None, C_in, L), lambda n: (n, 0, 0)),     # x, squeezed batch
            pl.BlockSpec((KH * KW, C_in, 1), lambda n: (0, 0, 0)),  # depthwise w (resident)
            pl.BlockSpec((C_out, C_in), lambda n: (0, 0)),          # pointwise w (resident)
            pl.BlockSpec((C_out, 1), lambda n: (0, 0)),             # folded bias (resident)
        ],
        out_specs=pl.BlockSpec((None, C_out, L), lambda n: (n, 0, 0)),
    )

    out_flat = pl.pallas_call(
        kernel,
        out_shape=jax.ShapeDtypeStruct((N, C_out, L), x.dtype),
        grid_spec=grid_spec,
        compiler_params=pltpu.CompilerParams(
            dimension_semantics=("parallel",)),
    )(xf, dww, pww, pwb)

    return out_flat.reshape(N, C_out, H, W)


def _reference(x, dw_weight, dw_bias, pw_weight, pw_bias, padding=1):
    """Plain-JAX reference mirroring the PyTorch module."""
    N, C_in, H, W = x.shape
    C_out = pw_weight.shape[0]
    xp = jnp.pad(x, ((0, 0), (0, 0), (padding, padding), (padding, padding)),
                 mode="reflect")
    # depthwise conv (groups=C_in), weight OIHW (C_in, 1, 3, 3)
    y = lax.conv_general_dilated(
        xp, dw_weight, window_strides=(1, 1), padding="VALID",
        dimension_numbers=("NCHW", "OIHW", "NCHW"),
        feature_group_count=C_in)
    y = y + dw_bias.reshape(1, C_in, 1, 1)
    # pointwise 1x1 conv
    z = jnp.einsum("oc,nchw->nohw", pw_weight.reshape(C_out, C_in), y)
    z = z + pw_bias.reshape(1, C_out, 1, 1)
    return z


if __name__ == "__main__":
    key = jax.random.PRNGKey(0)
    k_x, k_dw, k_db, k_pw, k_pb = jax.random.split(key, 5)

    # Small shapes consistent with the module: MyConv2d(4, 8, kernel_size=3, padding=1)
    N, C_in, C_out, H, W, K = 2, 4, 8, 16, 16, 3

    x = jax.random.normal(k_x, (N, C_in, H, W), dtype=jnp.float32)

    # Deterministic kaiming-normal-like init (fan_in scaling), synthetic params.
    dw_fan_in = 1 * K * K          # depthwise: groups=C_in -> 1 input ch per group
    dw_weight = jax.random.normal(k_dw, (C_in, 1, K, K), jnp.float32) * math.sqrt(2.0 / dw_fan_in)
    dw_bias = jax.random.uniform(k_db, (C_in,), jnp.float32,
                                 -1.0 / math.sqrt(dw_fan_in), 1.0 / math.sqrt(dw_fan_in))
    pw_fan_in = C_in * 1 * 1
    pw_weight = jax.random.normal(k_pw, (C_out, C_in, 1, 1), jnp.float32) * math.sqrt(2.0 / pw_fan_in)
    pw_bias = jax.random.uniform(k_pb, (C_out,), jnp.float32,
                                 -1.0 / math.sqrt(pw_fan_in), 1.0 / math.sqrt(pw_fan_in))

    out = my_conv2d(x, dw_weight, dw_bias, pw_weight, pw_bias, padding=1)
    out = jax.block_until_ready(out)

    ref = _reference(x, dw_weight, dw_bias, pw_weight, pw_bias, padding=1)
    assert out.shape == (N, C_out, H, W)
    assert jnp.allclose(out, ref, atol=1e-4, rtol=1e-4), "mismatch vs reference"

    print("KERNEL_OK")
</pallas_src>

<mosaic_0001>
module attributes {stable_mosaic.version = 11 : i64} {
  func.func @_sepconv_kernel(%arg0: i32, %arg1: memref<1x4x256xf32, #tpu.memory_space<vmem>>, %arg2: memref<9x4x1xf32, #tpu.memory_space<vmem>>, %arg3: memref<8x4xf32, #tpu.memory_space<vmem>>, %arg4: memref<8x1xf32, #tpu.memory_space<vmem>>, %arg5: memref<1x8x256xf32, #tpu.memory_space<vmem>>) attributes {dimension_semantics = [#tpu.dimension_semantics<parallel>], iteration_bounds = array<i64: 2>, scalar_prefetch = 0 : i64, scratch_operands = 0 : i64, tpu.core_type = #tpu.core_type<tc>, window_params = [{transform_indices = @transform_0, window_bounds = array<i64: 1, 4, 256>}, {pipeline_mode = #tpu.pipeline_mode<synchronous>, transform_indices = @transform_1, window_bounds = array<i64: 9, 4, 1>}, {pipeline_mode = #tpu.pipeline_mode<synchronous>, transform_indices = @transform_2, window_bounds = array<i64: 8, 4>}, {pipeline_mode = #tpu.pipeline_mode<synchronous>, transform_indices = @transform_3, window_bounds = array<i64: 8, 1>}, {transform_indices = @transform_4, window_bounds = array<i64: 1, 8, 256>}]} {
    %c0 = arith.constant 0 : index
    %c0_0 = arith.constant 0 : index
    %c0_1 = arith.constant 0 : index
    %0 = vector.load %arg1[%c0, %c0_0, %c0_1] : memref<1x4x256xf32, #tpu.memory_space<vmem>>, vector<1x4x256xf32>
    %1 = vector.shape_cast %0 : vector<1x4x256xf32> to vector<4x256xf32>
    %c0_2 = arith.constant 0 : index
    %c0_3 = arith.constant 0 : index
    %c0_4 = arith.constant 0 : index
    %2 = vector.load %arg2[%c0_2, %c0_3, %c0_4] : memref<9x4x1xf32, #tpu.memory_space<vmem>>, vector<9x4x1xf32>
    %3 = tpu.iota {dimensions = array<i32: 1>} : vector<4x256xi32>
    %c16_i32 = arith.constant 16 : i32
    %c0_i32 = arith.constant 0 : i32
    %4 = arith.cmpi eq, %c16_i32, %c0_i32 : i32
    %c1_i32 = arith.constant 1 : i32
    %5 = arith.select %4, %c1_i32, %c16_i32 : i32
    %6 = vector.broadcast %5 : i32 to vector<4x256xi32>
    %7 = arith.remsi %3, %6 : vector<4x256xi32>
    %c0_i32_5 = arith.constant 0 : i32
    %8 = vector.broadcast %c0_i32_5 : i32 to vector<4x256xi32>
    %9 = arith.cmpi ne, %7, %8 : vector<4x256xi32>
    %c0_i32_6 = arith.constant 0 : i32
    %10 = vector.broadcast %c0_i32_6 : i32 to vector<4x256xi32>
    %11 = arith.cmpi slt, %7, %10 : vector<4x256xi32>
    %c0_i32_7 = arith.constant 0 : i32
    %12 = arith.cmpi slt, %5, %c0_i32_7 : i32
    %13 = vector.broadcast %12 : i1 to vector<4x256xi1>
    %14 = vector.broadcast %13 : vector<4x256xi1> to vector<4x256xi1>
    %15 = arith.xori %11, %14 : vector<4x256xi1>
    %16 = arith.andi %15, %9 : vector<4x256xi1>
    %17 = vector.broadcast %5 : i32 to vector<4x256xi32>
    %18 = arith.addi %7, %17 : vector<4x256xi32>
    %19 = arith.select %16, %18, %7 : vector<4x256xi1>, vector<4x256xi32>
    %c0_i32_8 = arith.constant 0 : i32
    %20 = vector.broadcast %c0_i32_8 : i32 to vector<4x256xi32>
    %21 = arith.cmpi eq, %19, %20 : vector<4x256xi32>
    %c15_i32 = arith.constant 15 : i32
    %22 = vector.broadcast %c15_i32 : i32 to vector<4x256xi32>
    %23 = arith.cmpi eq, %19, %22 : vector<4x256xi32>
    %c16_i32_9 = arith.constant 16 : i32
    %24 = vector.broadcast %c16_i32_9 : i32 to vector<4x256xi32>
    %25 = arith.cmpi slt, %3, %24 : vector<4x256xi32>
    %c240_i32 = arith.constant 240 : i32
    %26 = vector.broadcast %c240_i32 : i32 to vector<4x256xi32>
    %27 = arith.cmpi sge, %3, %26 : vector<4x256xi32>
    %28 = vector.extract_strided_slice %1 {offsets = [0, 16], sizes = [4, 240], strides = [1, 1]} : vector<4x256xf32> to vector<4x240xf32>
    %29 = vector.extract_strided_slice %1 {offsets = [0, 0], sizes = [4, 16], strides = [1, 1]} : vector<4x256xf32> to vector<4x16xf32>
    %30 = tpu.concatenate %28, %29 in 1 : vector<4x240xf32>, vector<4x16xf32> -> vector<4x256xf32>
    %31 = vector.extract_strided_slice %1 {offsets = [0, 240], sizes = [4, 16], strides = [1, 1]} : vector<4x256xf32> to vector<4x16xf32>
    %32 = vector.extract_strided_slice %1 {offsets = [0, 0], sizes = [4, 240], strides = [1, 1]} : vector<4x256xf32> to vector<4x240xf32>
    %33 = tpu.concatenate %31, %32 in 1 : vector<4x16xf32>, vector<4x240xf32> -> vector<4x256xf32>
    %34 = arith.select %25, %30, %33 : vector<4x256xi1>, vector<4x256xf32>
    %35 = vector.extract_strided_slice %1 {offsets = [0, 240], sizes = [4, 16], strides = [1, 1]} : vector<4x256xf32> to vector<4x16xf32>
    %36 = vector.extract_strided_slice %1 {offsets = [0, 0], sizes = [4, 240], strides = [1, 1]} : vector<4x256xf32> to vector<4x240xf32>
    %37 = tpu.concatenate %35, %36 in 1 : vector<4x16xf32>, vector<4x240xf32> -> vector<4x256xf32>
    %38 = vector.extract_strided_slice %1 {offsets = [0, 16], sizes = [4, 240], strides = [1, 1]} : vector<4x256xf32> to vector<4x240xf32>
    %39 = vector.extract_strided_slice %1 {offsets = [0, 0], sizes = [4, 16], strides = [1, 1]} : vector<4x256xf32> to vector<4x16xf32>
    %40 = tpu.concatenate %38, %39 in 1 : vector<4x240xf32>, vector<4x16xf32> -> vector<4x256xf32>
    %41 = arith.select %27, %37, %40 : vector<4x256xi1>, vector<4x256xf32>
    %42 = vector.extract_strided_slice %2 {offsets = [4, 0, 0], sizes = [1, 4, 1], strides = [1, 1, 1]} : vector<9x4x1xf32> to vector<1x4x1xf32>
    %43 = vector.shape_cast %42 : vector<1x4x1xf32> to vector<4x1xf32>
    %44 = vector.broadcast %43 : vector<4x1xf32> to vector<4x256xf32>
    %45 = arith.mulf %1, %44 : vector<4x256xf32>
    %46 = vector.extract_strided_slice %34 {offsets = [0, 255], sizes = [4, 1], strides = [1, 1]} : vector<4x256xf32> to vector<4x1xf32>
    %47 = vector.extract_strided_slice %34 {offsets = [0, 0], sizes = [4, 255], strides = [1, 1]} : vector<4x256xf32> to vector<4x255xf32>
    %48 = tpu.concatenate %46, %47 in 1 : vector<4x1xf32>, vector<4x255xf32> -> vector<4x256xf32>
    %49 = vector.extract_strided_slice %34 {offsets = [0, 1], sizes = [4, 255], strides = [1, 1]} : vector<4x256xf32> to vector<4x255xf32>
    %50 = vector.extract_strided_slice %34 {offsets = [0, 0], sizes = [4, 1], strides = [1, 1]} : vector<4x256xf32> to vector<4x1xf32>
    %51 = tpu.concatenate %49, %50 in 1 : vector<4x255xf32>, vector<4x1xf32> -> vector<4x256xf32>
    %52 = arith.select %21, %51, %48 : vector<4x256xi1>, vector<4x256xf32>
    %53 = arith.select %23, %48, %51 : vector<4x256xi1>, vector<4x256xf32>
    %54 = vector.extract_strided_slice %2 {offsets = [0, 0, 0], sizes = [1, 4, 1], strides = [1, 1, 1]} : vector<9x4x1xf32> to vector<1x4x1xf32>
    %55 = vector.shape_cast %54 : vector<1x4x1xf32> to vector<4x1xf32>
    %56 = vector.broadcast %55 : vector<4x1xf32> to vector<4x256xf32>
    %57 = arith.mulf %52, %56 : vector<4x256xf32>
    %58 = arith.addf %45, %57 : vector<4x256xf32>
    %59 = vector.extract_strided_slice %2 {offsets = [1, 0, 0], sizes = [1, 4, 1], strides = [1, 1, 1]} : vector<9x4x1xf32> to vector<1x4x1xf32>
    %60 = vector.shape_cast %59 : vector<1x4x1xf32> to vector<4x1xf32>
    %61 = vector.broadcast %60 : vector<4x1xf32> to vector<4x256xf32>
    %62 = arith.mulf %34, %61 : vector<4x256xf32>
    %63 = arith.addf %58, %62 : vector<4x256xf32>
    %64 = vector.extract_strided_slice %2 {offsets = [2, 0, 0], sizes = [1, 4, 1], strides = [1, 1, 1]} : vector<9x4x1xf32> to vector<1x4x1xf32>
    %65 = vector.shape_cast %64 : vector<1x4x1xf32> to vector<4x1xf32>
    %66 = vector.broadcast %65 : vector<4x1xf32> to vector<4x256xf32>
    %67 = arith.mulf %53, %66 : vector<4x256xf32>
    %68 = arith.addf %63, %67 : vector<4x256xf32>
    %69 = vector.extract_strided_slice %1 {offsets = [0, 255], sizes = [4, 1], strides = [1, 1]} : vector<4x256xf32> to vector<4x1xf32>
    %70 = vector.extract_strided_slice %1 {offsets = [0, 0], sizes = [4, 255], strides = [1, 1]} : vector<4x256xf32> to vector<4x255xf32>
    %71 = tpu.concatenate %69, %70 in 1 : vector<4x1xf32>, vector<4x255xf32> -> vector<4x256xf32>
    %72 = vector.extract_strided_slice %1 {offsets = [0, 1], sizes = [4, 255], strides = [1, 1]} : vector<4x256xf32> to vector<4x255xf32>
    %73 = vector.extract_strided_slice %1 {offsets = [0, 0], sizes = [4, 1], strides = [1, 1]} : vector<4x256xf32> to vector<4x1xf32>
    %74 = tpu.concatenate %72, %73 in 1 : vector<4x255xf32>, vector<4x1xf32> -> vector<4x256xf32>
    %75 = arith.select %21, %74, %71 : vector<4x256xi1>, vector<4x256xf32>
    %76 = arith.select %23, %71, %74 : vector<4x256xi1>, vector<4x256xf32>
    %77 = vector.extract_strided_slice %2 {offsets = [3, 0, 0], sizes = [1, 4, 1], strides = [1, 1, 1]} : vector<9x4x1xf32> to vector<1x4x1xf32>
    %78 = vector.shape_cast %77 : vector<1x4x1xf32> to vector<4x1xf32>
    %79 = vector.broadcast %78 : vector<4x1xf32> to vector<4x256xf32>
    %80 = arith.mulf %75, %79 : vector<4x256xf32>
    %81 = arith.addf %68, %80 : vector<4x256xf32>
    %82 = vector.extract_strided_slice %2 {offsets = [5, 0, 0], sizes = [1, 4, 1], strides = [1, 1, 1]} : vector<9x4x1xf32> to vector<1x4x1xf32>
    %83 = vector.shape_cast %82 : vector<1x4x1xf32> to vector<4x1xf32>
    %84 = vector.broadcast %83 : vector<4x1xf32> to vector<4x256xf32>
    %85 = arith.mulf %76, %84 : vector<4x256xf32>
    %86 = arith.addf %81, %85 : vector<4x256xf32>
    %87 = vector.extract_strided_slice %41 {offsets = [0, 255], sizes = [4, 1], strides = [1, 1]} : vector<4x256xf32> to vector<4x1xf32>
    %88 = vector.extract_strided_slice %41 {offsets = [0, 0], sizes = [4, 255], strides = [1, 1]} : vector<4x256xf32> to vector<4x255xf32>
    %89 = tpu.concatenate %87, %88 in 1 : vector<4x1xf32>, vector<4x255xf32> -> vector<4x256xf32>
    %90 = vector.extract_strided_slice %41 {offsets = [0, 1], sizes = [4, 255], strides = [1, 1]} : vector<4x256xf32> to vector<4x255xf32>
    %91 = vector.extract_strided_slice %41 {offsets = [0, 0], sizes = [4, 1], strides = [1, 1]} : vector<4x256xf32> to vector<4x1xf32>
    %92 = tpu.concatenate %90, %91 in 1 : vector<4x255xf32>, vector<4x1xf32> -> vector<4x256xf32>
    %93 = arith.select %21, %92, %89 : vector<4x256xi1>, vector<4x256xf32>
    %94 = arith.select %23, %89, %92 : vector<4x256xi1>, vector<4x256xf32>
    %95 = vector.extract_strided_slice %2 {offsets = [6, 0, 0], sizes = [1, 4, 1], strides = [1, 1, 1]} : vector<9x4x1xf32> to vector<1x4x1xf32>
    %96 = vector.shape_cast %95 : vector<1x4x1xf32> to vector<4x1xf32>
    %97 = vector.broadcast %96 : vector<4x1xf32> to vector<4x256xf32>
    %98 = arith.mulf %93, %97 : vector<4x256xf32>
    %99 = arith.addf %86, %98 : vector<4x256xf32>
    %100 = vector.extract_strided_slice %2 {offsets = [7, 0, 0], sizes = [1, 4, 1], strides = [1, 1, 1]} : vector<9x4x1xf32> to vector<1x4x1xf32>
    %101 = vector.shape_cast %100 : vector<1x4x1xf32> to vector<4x1xf32>
    %102 = vector.broadcast %101 : vector<4x1xf32> to vector<4x256xf32>
    %103 = arith.mulf %41, %102 : vector<4x256xf32>
    %104 = arith.addf %99, %103 : vector<4x256xf32>
    %105 = vector.extract_strided_slice %2 {offsets = [8, 0, 0], sizes = [1, 4, 1], strides = [1, 1, 1]} : vector<9x4x1xf32> to vector<1x4x1xf32>
    %106 = vector.shape_cast %105 : vector<1x4x1xf32> to vector<4x1xf32>
    %107 = vector.broadcast %106 : vector<4x1xf32> to vector<4x256xf32>
    %108 = arith.mulf %94, %107 : vector<4x256xf32>
    %109 = arith.addf %104, %108 : vector<4x256xf32>
    %c0_10 = arith.constant 0 : index
    %c0_11 = arith.constant 0 : index
    %110 = vector.load %arg3[%c0_10, %c0_11] : memref<8x4xf32, #tpu.memory_space<vmem>>, vector<8x4xf32>
    %cst = arith.constant dense<0.000000e+00> : vector<8x256xf32>
    %111 = tpu.matmul %110, %109, %cst {dimension_numbers = #tpu.dot_dimension_numbers<[1], [0], [0], [1], [0, 0, 1, 1], [], []>} : vector<8x4xf32>, vector<4x256xf32>, vector<8x256xf32> -> vector<8x256xf32>
    %c0_12 = arith.constant 0 : index
    %c0_13 = arith.constant 0 : index
    %112 = vector.load %arg4[%c0_12, %c0_13] : memref<8x1xf32, #tpu.memory_space<vmem>>, vector<8x1xf32>
    %113 = vector.broadcast %112 : vector<8x1xf32> to vector<8x256xf32>
    %114 = arith.addf %111, %113 : vector<8x256xf32>
    %c0_14 = arith.constant 0 : index
    %c0_15 = arith.constant 0 : index
    %c0_16 = arith.constant 0 : index
    %115 = vector.load %arg5[%c0_14, %c0_15, %c0_16] : memref<1x8x256xf32, #tpu.memory_space<vmem>>, vector<1x8x256xf32>
    %116 = vector.shape_cast %115 : vector<1x8x256xf32> to vector<8x256xf32>
    %117 = vector.shape_cast %114 : vector<8x256xf32> to vector<1x8x256xf32>
    tpu.vector_store %arg5[%c0_14, %c0_15, %c0_16], %117 {strides = array<i32>} : memref<1x8x256xf32, #tpu.memory_space<vmem>>, vector<1x8x256xf32>,
    return
  }
  func.func @transform_0(%arg0: i32) -> (i32, i32, i32) {
    %c0_i32 = arith.constant 0 : i32
    %c0_i32_0 = arith.constant 0 : i32
    %c0_i32_1 = arith.constant 0 : i32
    return %arg0, %c0_i32, %c0_i32_0 : i32, i32, i32
  }
  func.func @transform_1(%arg0: i32) -> (i32, i32, i32) {
    %c0_i32 = arith.constant 0 : i32
    %c0_i32_0 = arith.constant 0 : i32
    %c0_i32_1 = arith.constant 0 : i32
    %c0_i32_2 = arith.constant 0 : i32
    return %c0_i32, %c0_i32_0, %c0_i32_1 : i32, i32, i32
  }
  func.func @transform_2(%arg0: i32) -> (i32, i32) {
    %c0_i32 = arith.constant 0 : i32
    %c0_i32_0 = arith.constant 0 : i32
    %c0_i32_1 = arith.constant 0 : i32
    return %c0_i32, %c0_i32_0 : i32, i32
  }
  func.func @transform_3(%arg0: i32) -> (i32, i32) {
    %c0_i32 = arith.constant 0 : i32
    %c0_i32_0 = arith.constant 0 : i32
    %c0_i32_1 = arith.constant 0 : i32
    return %c0_i32, %c0_i32_0 : i32, i32
  }
  func.func @transform_4(%arg0: i32) -> (i32, i32, i32) {
    %c0_i32 = arith.constant 0 : i32
    %c0_i32_0 = arith.constant 0 : i32
    %c0_i32_1 = arith.constant 0 : i32
    return %arg0, %c0_i32, %c0_i32_0 : i32, i32, i32
  }
}

</mosaic_0001>

<bundles_post_ra>
// kernel: tpu_custom_call.1
= control target key start
LH: loop header
LB: loop body
LE: loop exit
PB: predicated region body
PF: predicated region fallthrough
CT: control target
= control target key end

     0   :  { %9 = vsyncpa [#allocation3], 0  ;;  %s1011_s0 = inlined_call_operand.vmem [shape: f32[2,4,256], index: 0, kind: input, shape index: {}]   ;;  %s1012_s1 = inlined_call_operand.vmem [shape: f32[9,4,1], index: 1, kind: input, shape index: {}]   ;;  %s1013_s2 = inlined_call_operand.vmem [shape: f32[8,4], index: 2, kind: input, shape index: {}]   ;;  %s1014_s3 = inlined_call_operand.vmem [shape: f32[8,1], index: 3, kind: input, shape index: {}]   ;;  %s1015_s4 = inlined_call_operand.hbm [shape: f32[2,8,256], index: 4, kind: output, shape index: {}]  }
   0x1   :  { %11 = vsyncpa [#allocation3 + $0x1], 0  ;;  %s779_s15 = smov 0   ;;  %s781_s16 = smov 0  }
   0x2   :  { %s783_s17 = smov 0   ;;  %s785_s18 = smov 0  }
   0x3 LB: > { %s800_s19 = sadd.s32 4294967295, %s746_s18   ;;  %s618_s20 = sadd.s32 4294967294, %s746_s18   ;;  %s746_s18 = sphi %s785_s18, %s1029_s18   ;;  %s742_s17 = sphi %s783_s17, %s1028_s17   ;;  %s738_s16 = sphi %s781_s16, %s1027_s16   ;;  %s734_s15 = sphi %s779_s15, %s1026_s15  }
   0x4   : > { %s804_s21 = sadd.s32 1, %s746_s18   ;;  %s113_s22 = sadd.s32 1, %s742_s17 }
   0x5   : > { %s110_s23 = ssub.s32 %s746_s18, %s804_s21  ;;  %p123_p0 = scmp.ne.s32.totalorder %s742_s17, %s738_s16 }
   0x6   : > { %p111_p1 = scmp.eq.s32.totalorder %s110_s23, 0  ;;  %p124_p2 = scmp.eq.s32.totalorder %s800_s19, 1 }
   0x7   : > { %p129_p3 = scmp.ne.s32.totalorder %s738_s16, %s734_s15  ;;  %p130_p4 = scmp.eq.s32.totalorder %s618_s20, 1 }
   0x8   : > { %s815_s24 = scalar_select %p111_p1, %s742_s17, %s113_s22  }
   0x9   : > { %p817_p5 = por %p124_p2, %p123_p0  ;;  %p821_p6 = por %p130_p4, %p129_p3 }
   0xa   : > { %p621_p7 = scmp.ge.s32.totalorder %s746_s18, 1  ;;  %p165_p8 = scmp.lt.s32.totalorder %s746_s18, 3 }
   0xc   : > { %p166_p9 = pnand %p621_p7, %p165_p8 }
   0xd   : > { %p191_p10 = scmp.lt.s32.totalorder (!%p166_p9), %s800_s19, 1  ;;  %s749_s10 = smov (!%p166_p9), 112  }
   0xe   : > { %169 = sbr.rel (%p166_p9) target bundleno = 463 (0x1cf), region = 36  ;;  %s750_s13 = smov (!%p166_p9), 16  }
   0xf   : > { %s188_s20 = sand.u32 (!%p166_p9), 1, %s738_s16   ;;  %s635_s23 = sshll.u32 (!%p166_p9), %s800_s19, 4 }
  0x10   : > { %s622_s22 = sshll.u32 (!%p166_p9), %s188_s20, 4  ;;  %s704_s11 = scalar_lea.hbm (!%p166_p9), %s1015_s4, 32 }
  0x13   : > { %v197_v0 = vld [vmem:[%s1012_s1] sm:$0xf]  ;;  %v748_v1 = vmov 0   ;;  %s192_s29 = scalar_select %p191_p10, %s800_s19, 1  ;;  %v201_v3 = vld [vmem:[%s1012_s1 + $0x10] sm:$0xf]  ;;  %v206_v26 = vlaneseq }
  0x14   : > { %681 = vset.pattern.permute.xlu1 %v748_v1  ;;  %683 = vset.pattern.permute.xlu0 %v748_v1  ;;  %v198_v7 = vld [vmem:[%s1012_s1 + $0x4] sm:$0xf]  ;;  %v200_v9 = vld [vmem:[%s1012_s1 + $0xc] sm:$0xf]  ;;  %v199_v12 = vld [vmem:[%s1012_s1 + $0x8] sm:$0xf] }
  0x15   : > { %318 = vperm.xlu1 %681, %v197_v0   ;;  %682 = vset.pattern.permute.xlu2 %v748_v1  ;;  %s634_s30 = sshll.u32 %s192_s29, 3  ;;  %v202_v14 = vld [vmem:[%s1012_s1 + $0x14] sm:$0xf]  ;;  %s751_s29 = smov 1   ;;  %v207_v27 = vand.u32 127, %v206_v26  ;;  %vm249_vm0 = vcmask 916480  }
  0x16   : > { %s195_s7 = scalar_lea.vmem %s1011_s0, %s634_s30  ;;  %282 = vperm.xlu2 %682, %v201_v3   ;;  %s752_s30 = smov 127   ;;  %vm271_vm1 = vcmask 130048   ;;  %vm326_vm3 = vcmask 1043456   ;;  %v204_v45 = vld [vmem:[%s1012_s1 + $0x1c] sm:$0xf]  ;;  %vm297_vm5 = vcmask 7168  }
  0x17   : > { %v835_v2 = vld [vmem:[%s195_s7] sm:$0xff]  ;;  %vm237_vm2 = vcmp.lt.s32.totalorder %v207_v27, 16  ;;  %v208_v37 = vadd.s32 128, %v207_v27  ;;  %v203_v48 = vld [vmem:[%s1012_s1 + $0x18] sm:$0xf]  ;;  %v213_v51 = vand.u32 15, %v207_v27 }
  0x18   : > { %242 = vst [vmem:[#allocation1] ss:$2 sm:$0xff] %v835_v2  ;;  %v205_v50 = vld [vmem:[%s1012_s1 + $0x20] sm:$0xf]  ;;  %vm306_vm6 = vcmask 1039360   ;;  %vm492_vm11 = vcmask 31744  }
  0x19   : > { %vm240_vm4 = vcmp.ge.s32.totalorder %v208_v37, 240  ;;  %v220_v52 = vand.u32 15, %v208_v37  ;;  %vm903_vm7 = vcmp.eq.s32.totalorder %v213_v51, 0  ;;  %vm907_vm8 = vcmp.eq.s32.totalorder %v213_v51, 15  ;;  %v482_v60 = vld [vmem:[%s1014_s3] sm:$0xff]  ;;  %s543_s7 = scalar_lea.sflag [#allocation3], %s188_s20 }
  0x1a   : > { %v481_v54 = vld [vmem:[%s1013_s2] sm:$0xff] }
  0x1b   : > { %vm913_vm9 = vcmp.eq.s32.totalorder %v220_v52, 0  ;;  %vm917_vm10 = vcmp.eq.s32.totalorder %v220_v52, 15 }
  0x1f   : > { %v243_v4 = vld.sshfl [vmem:[#allocation1] sm:$0xff pattern:$0x75316420]  ;;  %v244_v5 = vld.sshfl [vmem:[#allocation1 + $0x8] sm:$0xff pattern:$0x75316420] }
  0x20   : > { %245 = vrot.lane.b32.xlu0 %v243_v4, %s749_s10  ;;  %253 = vst [vmem:[#allocation1] ss:$2 sm:$0xff] %v835_v2 }
  0x27   : > { %v254_v6 = vld.sshfl [vmem:[#allocation1] sm:$0xff pattern:$0x75316420] }
  0x28   : > { %247 = vrot.lane.b32.xlu0 %v244_v5, %s749_s10  ;;  %259 = vst [vmem:[#allocation1] ss:$2 sm:$0xff] %v835_v2  ;;  %255 = vrot.lane.b32.xlu2 %v254_v6, %s749_s10 }
  0x2f   : > { %v260_v8 = vld.sshfl [vmem:[#allocation1 + $0x8] sm:$0xff pattern:$0x75316420] }
  0x30   : > { %261 = vrot.lane.b32.xlu1 %v260_v8, %s750_s13  ;;  %264 = vst [vmem:[#allocation1] ss:$2 sm:$0xff] %v835_v2  ;;  %332 = vperm.xlu0 %683, %v198_v7  }
  0x37   : > { %v265_v10 = vld.sshfl [vmem:[#allocation1] sm:$0xff pattern:$0x75316420]  ;;  %v266_v11 = vld.sshfl [vmem:[#allocation1 + $0x8] sm:$0xff pattern:$0x75316420] }
  0x38   : > { %267 = vrot.lane.b32.xlu1 %v265_v10, %s750_s13  ;;  %394 = vperm.xlu0 %683, %v200_v9   ;;  %356 = vst [vmem:[#allocation1] ss:$2 sm:$0xff] %v835_v2 }
  0x39   : > { %269 = vrot.lane.b32.xlu2 %v266_v11, %s750_s13 }
  0x3f   : > { %v357_v13 = vld.sshfl [vmem:[#allocation1 + $0x8] sm:$0xff pattern:$0x75316420] }
  0x40   : > { %345 = vperm.xlu1 %681, %v199_v12   ;;  %361 = vst [vmem:[#allocation1] ss:$2 sm:$0xff] %v835_v2 }
  0x47   : > { %v363_v15 = vld.sshfl [vmem:[#allocation1 + $0x8] sm:$0xff pattern:$0x75316420]  ;;  %v362_v16 = vld.sshfl [vmem:[#allocation1] sm:$0xff pattern:$0x75316420] }
  0x48   : > { %407 = vperm.xlu1 %681, %v202_v14   ;;  %364 = vrot.lane.b32.xlu2 %v362_v16, %s751_s29  ;;  %372 = vst [vmem:[#allocation1] ss:$2 sm:$0xff] %v835_v2  ;;  %v753_v16 = vmov 839922192  }
  0x4f   : > { %v373_v17 = vld.sshfl [vmem:[#allocation1] sm:$0xff pattern:$0x75316420]  ;;  %v374_v18 = vld.sshfl [vmem:[#allocation1 + $0x8] sm:$0xff pattern:$0x75316420] }
  0x50   : > { %358 = vrot.lane.b32.xlu1 %v357_v13, %s751_s29  ;;  %382 = vst [vmem:[#allocation1] ss:$2 sm:$0xff] %v835_v2  ;;  %377 = vrot.lane.b32.xlu2 %v374_v18, %s752_s30 }
  0x57   : > { %v383_v19 = vld.sshfl [vmem:[#allocation1] sm:$0xff pattern:$0x75316420] }
  0x58   : > { %366 = vrot.lane.b32.xlu1 %v363_v15, %s751_s29  ;;  %384 = vrot.lane.b32.xlu0 %v383_v19, %s752_s30 }
  0x59   : > { %375 = vrot.lane.b32.xlu2 %v373_v17, %s752_s30  ;;  %v285_v17 = vunpack.c.l.s4 %v753_v16 }
  0x70   : > { %v866_v20 = vpop.permute.xlu2 %282 }
  0x82   : > { %v256_v23 = vpop.permute.xlu2 %255 }
  0x87   : > { %v868_v22 = vpop.permute.xlu1 %318 }
  0x92   : > { %v246_v21 = vpop.permute.xlu0 %245 }
  0x93   : > { %v270_v28 = vpop.permute.xlu2 %269 }
  0x9a   : > { %v248_v24 = vpop.permute.xlu0 %247 }
  0x9b   : > { %v871_v29 = vsel %vm249_vm0, %v246_v21, %v248_v24  ;;  %v258_v42 = vsel %vm249_vm0, %v248_v24, %v256_v23  ;;  %v286_v21 = vunpack.c.0.s8 %v285_v17 }
  0x9d   : > { %v287_v23 = vperm.slane %v866_v20, %v286_v21 }
  0xa2   : > { %v262_v25 = vpop.permute.xlu1 %261  ;;  %v333_v30 = vpop.permute.xlu0 %332 }
  0xa3   : > { %v365_v41 = vpop.permute.xlu2 %364 }
  0xaa   : > { %v268_v31 = vpop.permute.xlu1 %267  ;;  %v395_v47 = vpop.permute.xlu0 %394 }
  0xab   : > { %v272_v32 = vsel %vm271_vm1, %v268_v31, %v270_v28  ;;  %v275_v33 = vsel %vm271_vm1, %v262_v25, %v268_v31  ;;  %v378_v46 = vpop.permute.xlu2 %377 }
  0xac   : > { %v276_v34 = vsel %vm237_vm2, %v871_v29, %v275_v33  ;;  %v336_v35 = vmul.f32 %v333_v30, %v272_v32  ;;  %291 = vrot.lane.b32.xlu0 %v272_v32, %s751_s29  ;;  %v884_v43 = vsel %vm240_vm4, %v272_v32, %v258_v42 }
  0xad   : > { %v335_v36 = vmul.f32 %v333_v30, %v276_v34  ;;  %295 = vrot.lane.b32.xlu1 %v276_v34, %s751_s29  ;;  %302 = vrot.lane.b32.xlu2 %v276_v34, %s752_s30 }
  0xae   : > { %v339_v38 = vrot.slane %v336_v35, 4 }
  0xb0   : > { %v878_v39 = vsel %vm326_vm3, %v335_v36, %v339_v38 }
  0xb2   : > { %v880_v40 = vpop.permute.xlu1 %345 }
  0xb3   : > { %v376_v53 = vpop.permute.xlu2 %375 }
  0xb4   : > { %304 = vrot.lane.b32.xlu0 %v272_v32, %s752_s30  ;;  %v379_v57 = vsel %vm306_vm6, %v376_v53, %v378_v46 }
  0xb5   : > { %429 = vrot.lane.b32.xlu1 %v871_v29, %s752_s30  ;;  %419 = vrot.lane.b32.xlu2 %v884_v43, %s751_s29 }
  0xba   : > { %v408_v44 = vpop.permute.xlu1 %407 }
  0xbc   : > { %423 = vrot.lane.b32.xlu0 %v871_v29, %s751_s29  ;;  %s554_s29 = scalar_lea.hbm %s1015_s4, %s635_s23 }
  0xbd   : > { %457 = vperm.xlu1 %681, %v204_v45   ;;  %431 = vrot.lane.b32.xlu2 %v884_v43, %s752_s30  ;;  %s190_s30 = scalar_lea.vmem [#allocation2], %s622_s22  ;;  %s558_s6 = sshll.u32 %s554_s29, 4  ;;  %s559_s6 = int_to_ptr.hbm [resolvable:$true] %s558_s6 }
  0xbe   : > { %s556_s5 = sshll.u32 %s190_s30, 4  ;;  %s698_s8 = sshra.s32 %s559_s6, 4  ;;  %s557_s5 = int_to_ptr.vmem [resolvable:$true] %s556_s5  ;;  %s699_s8 = int_to_ptr.hbm [resolvable:$true] %s698_s8 }
  0xbf   : > { %s700_s19 = scalar_lea.hbm %s699_s8, 16  ;;  %p705_p0 = scmp.lt.s32.totalorder %s699_s8, %s1015_s4 }
  0xc0   : > { %p701_p11 = scmp.ne.s32.totalorder %s699_s8, %s700_s19  ;;  %p706_p1 = scmp.lt.s32.totalorder %s704_s11, %s700_s19 }
  0xc2   : > { %v359_v49 = vpop.permute.xlu1 %358  ;;  %p702_p12 = pnand %p701_p11, %p817_p5  ;;  %p707_p2 = por %p706_p1, %p705_p0 }
  0xc3   : > { %v371_v56 = vsel %vm297_vm5, %v359_v49, %v365_v41 }
  0xc4   : > { %444 = vperm.xlu0 %683, %v203_v48   ;;  %v388_v61 = vsel %vm903_vm7, %v379_v57, %v371_v56  ;;  %v390_v3 = vsel %vm907_vm8, %v371_v56, %v379_v57  ;;  %p703_p13 = pneg %p702_p12 }
  0xc5   : > { %470 = vperm.xlu2 %682, %v205_v50   ;;  %v397_v6 = vmul.f32 %v395_v47, %v388_v61  ;;  %v410_v9 = vmul.f32 %v408_v44, %v390_v3 }
  0xc6   : > { %p708_p3 = pnand %p707_p2, %p703_p13 }
  0xca   : > { %v367_v62 = vpop.permute.xlu1 %366  ;;  %v385_v63 = vpop.permute.xlu0 %384 }
  0xcb   : > { %v368_v0 = vsel %vm297_vm5, %v365_v41, %v367_v62  ;;  %v387_v1 = vsel %vm306_vm6, %v378_v46, %v385_v63 }
  0xcc   : > { %v389_v4 = vsel %vm913_vm9, %v387_v1, %v368_v0  ;;  %v391_v5 = vsel %vm917_vm10, %v368_v0, %v387_v1  ;;  %485 = vperm.xlu0 %683, %v482_v60  }
  0xcd   : > { %v398_v7 = vmul.f32 %v395_v47, %v389_v4  ;;  %v411_v8 = vmul.f32 %v408_v44, %v391_v5  ;;  %v289_v44 = vmul.f32 %v287_v23, %v835_v2 }
  0xcf   : > { %v401_v10 = vrot.slane %v398_v7, 4  ;;  %v414_v11 = vrot.slane %v411_v8, 4 }
  0xd1   : > { %v402_v12 = vsel %vm326_vm3, %v397_v6, %v401_v10  ;;  %v415_v13 = vsel %vm326_vm3, %v410_v9, %v414_v11 }
 0x107   : > { %v303_v14 = vpop.permute.xlu2 %302 }
 0x10f   : > { %v420_v15 = vpop.permute.xlu2 %419 }
 0x117   : > { %v432_v24 = vpop.permute.xlu2 %431 }
 0x11e   : > { %v292_v18 = vpop.permute.xlu0 %291 }
 0x11f   : > { %v296_v19 = vpop.permute.xlu1 %295  ;;  %v471_v52 = vpop.permute.xlu2 %470 }
 0x120   : > { %v298_v26 = vsel %vm297_vm5, %v296_v19, %v292_v18  ;;  %v301_v27 = vsel %vm297_vm5, %v292_v18, %v296_v19 }
 0x126   : > { %v305_v25 = vpop.permute.xlu0 %304 }
 0x127   : > { %v307_v28 = vsel %vm306_vm6, %v303_v14, %v305_v25  ;;  %v311_v30 = vsel %vm306_vm6, %v305_v25, %v303_v14  ;;  %v430_v34 = vpop.permute.xlu1 %429 }
 0x128   : > { %v312_v31 = vsel %vm903_vm7, %v307_v28, %v301_v27  ;;  %v313_v32 = vsel %vm913_vm9, %v311_v30, %v298_v26  ;;  %v314_v33 = vsel %vm907_vm8, %v301_v27, %v307_v28  ;;  %v315_v20 = vsel %vm917_vm10, %v298_v26, %v311_v30 }
 0x129   : > { %v322_v35 = vmul.f32 %v868_v22, %v313_v32  ;;  %v349_v36 = vmul.f32 %v880_v40, %v315_v20  ;;  %v321_v37 = vmul.f32 %v868_v22, %v312_v31  ;;  %v348_v41 = vmul.f32 %v880_v40, %v314_v33 }
 0x12a   : > { %v433_v49 = vsel %vm306_vm6, %v430_v34, %v432_v24  ;;  %v437_v50 = vsel %vm306_vm6, %v432_v24, %v430_v34 }
 0x12b   : > { %v325_v38 = vrot.slane %v322_v35, 4  ;;  %v352_v42 = vrot.slane %v349_v36, 4 }
 0x12d   : > { %v327_v45 = vsel %vm326_vm3, %v321_v37, %v325_v38  ;;  %v353_v46 = vsel %vm326_vm3, %v348_v41, %v352_v42 }
 0x12e   : > { %v329_v47 = vadd.f32 %v327_v45, %v289_v44  ;;  %v424_v48 = vpop.permute.xlu0 %423 }
 0x12f   : > { %v425_v51 = vsel %vm297_vm5, %v424_v48, %v420_v15  ;;  %v428_v22 = vsel %vm297_vm5, %v420_v15, %v424_v48  ;;  %v458_v60 = vpop.permute.xlu1 %457 }
 0x130   : > { %v342_v40 = vadd.f32 %v878_v39, %v329_v47  ;;  %v440_v2 = vsel %vm907_vm8, %v428_v22, %v433_v49  ;;  %v441_v53 = vsel %vm917_vm10, %v425_v51, %v437_v50  ;;  %v461_v1 = vmul.f32 %v458_v60, %v884_v43 }
 0x131   : > { %v474_v56 = vmul.f32 %v471_v52, %v441_v53  ;;  %v473_v61 = vmul.f32 %v471_v52, %v440_v2  ;;  %v439_v39 = vsel %vm913_vm9, %v437_v50, %v425_v51  ;;  %v438_v59 = vsel %vm903_vm7, %v433_v49, %v428_v22 }
 0x132   : > { %v355_v57 = vadd.f32 %v353_v46, %v342_v40  ;;  %v464_v5 = vrot.slane %v461_v1, 4  ;;  %v460_v8 = vmul.f32 %v458_v60, %v871_v29 }
 0x133   : > { %v477_v62 = vrot.slane %v474_v56, 4 }
 0x134   : > { %v404_v63 = vadd.f32 %v402_v12, %v355_v57  ;;  %v465_v43 = vsel %vm326_vm3, %v460_v8, %v464_v5 }
 0x135   : > { %v478_v0 = vsel %vm326_vm3, %v473_v61, %v477_v62 }
 0x136   : > { %v417_v3 = vadd.f32 %v415_v13, %v404_v63  ;;  %v445_v4 = vpop.permute.xlu0 %444 }
 0x137   : > { %v448_v55 = vmul.f32 %v445_v4, %v439_v39  ;;  %v447_v6 = vmul.f32 %v445_v4, %v438_v59 }
 0x139   : > { %v451_v7 = vrot.slane %v448_v55, 4 }
 0x13b   : > { %v452_v9 = vsel %vm326_vm3, %v447_v6, %v451_v7 }
 0x13c   : > { %v454_v10 = vadd.f32 %v452_v9, %v417_v3 }
 0x13e   : > { %v467_v11 = vadd.f32 %v465_v43, %v454_v10  ;;  %v486_v29 = vpop.permute.xlu0 %485 }
 0x140   : > { %v480_v58 = vadd.f32 %v478_v0, %v467_v11 }
 0x142   : > { %489 = vst [vmem:[#allocation1] ss:$2 sm:$0xff] %v480_v58 }
 0x149   : > { %v490_v12 = vld.sshfl [vmem:[#allocation1] sm:$0xff pattern:$0x75316420]  ;;  %v491_v13 = vld.sshfl [vmem:[#allocation1 + $0x8] sm:$0xff pattern:$0x75316420] }
 0x14a   : > { %625 = vmatpush.msk.msra.mxu0 %vm326_vm3, %v490_v12  ;;  %627 = vmatpush.msk.msra.mxu1 %vm326_vm3, %v491_v13 }
 0x14b   : > { %626 = vmatmul.msk.f32.vlgmr.msra.gmra.mxu0 %vm492_vm11, %v481_v54  ;;  %628 = vmatmul.msk.f32.vlgmr.msra.gmra.mxu1 %vm492_vm11, %v481_v54 }
 0x1c8   : > { %v517_v14 = vpop.f32.mrf.mxu0  ;;  %v537_v15 = vpop.f32.mrf.mxu1 }
 0x1c9   : > { %v518_v16 = vadd.f32 %v517_v14, %v486_v29  ;;  %v538_v17 = vadd.f32 %v537_v15, %v486_v29 }
 0x1cb   : > { %540 = vst [vmem:[%s190_s30] sm:$0xff] %v518_v16 }
 0x1cc   : > { %541 = vst [vmem:[%s190_s30 + $0x8] sm:$0xff] %v538_v17 }
 0x1cd   : > { %711 = shalt.err (!%p708_p3)
}
 0x1ce   : > { %636 = dma.vmem_to_hbm [thread:$0]  (%p817_p5), %s557_s5, 256, %s559_s6, %s543_s7  }
 0x1cf PF: > { %p642_p4 = scmp.ge.s32.totalorder %s746_s18, 2  ;;  %s570_s14 = sand.u32 1, %s734_s15  }
 0x1d0   : > { %s571_s20 = scalar_lea.sflag [#allocation3], %s570_s14 }
 0x1d1   : > { %p639_p7 = pnand %p642_p4, %p821_p6 }
 0x1d3   : > { %p640_p8 = pneg %p639_p7 }
 0x1d5   : > { %729 = dma.done.wait (%p640_p8), %s571_s20, 256  }
 0x1d6   : > { %731 = vsyncadd (%p640_p8), %s571_s20, 4294967040  ;;  %p14_p9 = scmp.ge.s32.totalorder %s804_s21, 4   ;;  %s1026_s15 = smov %s738_s16 }
 0x1d7   : > { %s1027_s16 = smov %s742_s17  ;;  %s1028_s17 = smov %s815_s24 }
 0x1d8   : > { %s1029_s18 = smov %s804_s21  ;;  %16 = sbr.rel (!%p14_p9) target bundleno = 3 (0x3), region = 71 }
 0x1dd   :  { %577 = vsyncpa [#allocation3], 1 }
 0x1de   :  { %579 = vsyncpa [#allocation3 + $0x1], 1 }

</bundles_post_ra>
